<compile_context>
chip_gen: v7x
topology: tpu7x:2x2x1
jax: 0.10.0
libtpu: 0.0.40
codegen_flags: <defaults>
</compile_context>

<pallas_src>
import functools

import jax
import jax.numpy as jnp
from jax.experimental import pallas as pl
from jax.experimental.pallas import tpu as pltpu


# ---------------------------------------------------------------------------
# Kernel
# ---------------------------------------------------------------------------
def _causal_conv1d_kernel(x_ref, w_ref, b_ref, o_ref, xpad_ref, *,
                          kernel_size, fuse_taps, compute_dtype):
    """One (batch row, time tile) grid step.

    x_ref   : (1, C, Tb)                       current input time tile
    w_ref   : (C, K*C) if fuse_taps else (K, C, C)   weights (constant block)
    b_ref   : (C, 1)                           bias, f32
    o_ref   : (1, C, Tb)                       output tile
    xpad_ref: (C, Tb + K - 1) VMEM stage: [K-1 halo | current tile]

    INVARIANT (do not break): the time grid axis must stay innermost and
    sequential ("arbitrary"), and each core must own contiguous batch rows,
    because the halo carried in xpad_ref[:, :K-1] belongs to the previous time
    tile of the SAME batch row and is reset only at t == 0.
    """
    K = kernel_size
    C = o_ref.shape[1]
    Tb = o_ref.shape[2]
    t = pl.program_id(1)

    x_tile = x_ref[0]                                      # (C, Tb)
    if compute_dtype is not None:
        # Cast activations in-kernel (MXU operand dtype); avoids the extra full
        # HBM read+write a wrapper-side x.astype() would cost.
        x_tile = x_tile.astype(compute_dtype)

    if K > 1:
        # Causal left edge: the halo of the first time tile of every batch row
        # is zeros (== PyTorch's F.pad(left=K-1)).
        @pl.when(t == 0)
        def _():
            xpad_ref[:, :K - 1] = jnp.zeros((C, K - 1), xpad_ref.dtype)

        # Stage the current tile once after the carried halo; every shifted
        # window is then a static slice of this buffer (no per-tap concats of
        # shifted copies).
        xpad_ref[:, K - 1:] = x_tile

        def window(k):                                     # (C, Tb)
            return xpad_ref[:, k:k + Tb]
    else:
        def window(k):
            del k
            return x_tile

    if fuse_taps:
        # Small C: fold the K taps into a single MXU contraction of depth K*C.
        xs = jnp.concatenate([window(k) for k in range(K)], axis=0)  # (K*C, Tb)
        acc = jnp.dot(w_ref[...], xs, preferred_element_type=jnp.float32)
    else:
        # Larger C: K chained (C,C)x(C,Tb) matmuls (MXU already well filled;
        # on v7x the MRB accumulates these in place).
        acc = jnp.dot(w_ref[0], window(0), preferred_element_type=jnp.float32)
        for k in range(1, K):
            acc = acc + jnp.dot(w_ref[k], window(k),
                                preferred_element_type=jnp.float32)

    acc = acc + b_ref[...]                                 # bias (C,1) broadcast
    o_ref[0] = acc.astype(o_ref.dtype)

    if K > 1:
        # Carry: the last K-1 columns of [halo | tile] are exactly the halo the
        # next time tile needs (also correct when Tb < K-1).
        xpad_ref[:, :K - 1] = xpad_ref[:, Tb:]


# ---------------------------------------------------------------------------
# Host-side helpers
# ---------------------------------------------------------------------------
def _tpu_vmem_and_fuse_threshold():
    """(vmem_capacity_bytes, tap-fusion C threshold) with safe fallbacks."""
    vmem_cap = 64 * 1024 * 1024          # conservative fallback (v7x-sized)
    fuse_c_threshold = 256               # v6e/v7x MXU contraction depth
    try:
        vmem_cap = int(pltpu.get_tpu_info().vmem_capacity_bytes)
    except Exception:
        pass
    try:
        kind = jax.devices()[0].device_kind.lower()
        if "v5 lite" in kind or "v5e" in kind or "v5lite" in kind:
            fuse_c_threshold = 128       # v5e MXU depth is 128: C>=128 per tap already fills it
    except Exception:
        pass
    return vmem_cap, fuse_c_threshold


def _choose_time_tile(T, t_blk_max):
    """Pick a lane-dense (multiple-of-128) time tile; returns (t_blk, T_padded)."""
    cap = max(128, (t_blk_max // 128) * 128)
    if T <= 128:
        return T, T                      # tiny sequence: one full-extent tile
    if T <= cap:
        t_blk = -(-T // 128) * 128       # round up: lane-dense single tile
        return t_blk, t_blk
    # Large T: prefer an exact lane-dense divisor close to the cap, otherwise
    # take the cap itself and right-pad the (< t_blk) remainder.
    for cand in range(cap, max(cap // 2, 256) - 1, -128):
        if T % cand == 0:
            return cand, T
    return cap, -(-T // cap) * cap


def causal_conv1d(x, weight, bias, kernel_size, *, t_blk_max=None,
                  compute_dtype=None, fuse_taps=None):
    """Causal Conv1d. x: (B, C, T), weight: (C, C, K) (PyTorch layout), bias: (C,)."""
    B, C, T = x.shape
    K = kernel_size
    assert weight.shape == (C, C, K)
    assert bias.shape == (C,)
    out_dtype = x.dtype

    vmem_cap, fuse_thr = _tpu_vmem_and_fuse_threshold()
    if t_blk_max is None:
        # v5e/v6e (128 MiB VMEM) afford larger time tiles than v7x (64 MiB).
        t_blk_max = 1024 if vmem_cap >= 100 * 1024 * 1024 else 512
    vmem_limit = int(min(vmem_cap * 3 // 4, 100 * 1024 * 1024))

    if fuse_taps is None:
        fuse_taps = C < fuse_thr

    # Weight layout: contraction-flattened (C, K*C) for the fused single-matmul
    # path; tap-major (K, C, C) for the chained-matmul path.  Only the (small)
    # weight is cast in the wrapper; activations are cast inside the kernel.
    if fuse_taps:
        w_in = jnp.transpose(weight, (0, 2, 1)).reshape(C, K * C)
        w_block, w_imap = (C, K * C), (lambda b, t: (0, 0))
    else:
        w_in = jnp.transpose(weight, (2, 0, 1))            # (K, C, C)
        w_block, w_imap = (K, C, C), (lambda b, t: (0, 0, 0))
    if compute_dtype is not None:
        w_in = w_in.astype(compute_dtype)
    b_col = bias.astype(jnp.float32).reshape(C, 1)

    t_blk, t_total = _choose_time_tile(T, t_blk_max)
    if t_total != T:
        # Zeros past the end never feed earlier outputs in a causal conv; the
        # padded tail is sliced off below.
        x = jnp.pad(x, ((0, 0), (0, 0), (0, t_total - T)))
    n_t = t_total // t_blk

    stage_dtype = compute_dtype if compute_dtype is not None else x.dtype
    xpad_cols = t_blk + K - 1 if K > 1 else 1

    kernel = functools.partial(_causal_conv1d_kernel, kernel_size=K,
                               fuse_taps=fuse_taps, compute_dtype=compute_dtype)

    cost = pl.CostEstimate(
        flops=2 * B * C * C * K * t_total,
        transcendentals=0,
        bytes_accessed=int(x.size * x.dtype.itemsize
                           + B * C * t_total * jnp.dtype(out_dtype).itemsize
                           + w_in.size * w_in.dtype.itemsize
                           + b_col.size * b_col.dtype.itemsize),
    )

    def build(single_buffer_consts):
        const_kw = ({"pipeline_mode": pl.Buffered(1)}
                    if single_buffer_consts else {})
        return pl.pallas_call(
            kernel,
            out_shape=jax.ShapeDtypeStruct((B, C, t_total), out_dtype),
            grid_spec=pltpu.PrefetchScalarGridSpec(
                num_scalar_prefetch=0,
                grid=(B, n_t),
                in_specs=[
                    # per-(batch, time tile) input block — auto double-buffered
                    pl.BlockSpec((1, C, t_blk), lambda b, t: (b, 0, t)),
                    # constant-index weight / bias blocks: DMA'd once; single-
                    # buffered (when supported) to halve their VMEM footprint.
                    pl.BlockSpec(w_block, w_imap, **const_kw),
                    pl.BlockSpec((C, 1), lambda b, t: (0, 0), **const_kw),
                ],
                out_specs=pl.BlockSpec((1, C, t_blk), lambda b, t: (b, 0, t)),
                scratch_shapes=[
                    # [K-1 halo | staged tile]; the halo persists across the
                    # sequential time axis and is reset at t == 0.
                    pltpu.VMEM((C, xpad_cols), stage_dtype),
                ],
            ),
            compiler_params=pltpu.CompilerParams(
                # Batch axis may shard across TensorCores; the time axis MUST
                # stay innermost and sequential because of the halo carry.
                dimension_semantics=("parallel", "arbitrary"),
                vmem_limit_bytes=vmem_limit,
            ),
            cost_estimate=cost,
        )

    try:
        out = build(single_buffer_consts=True)(x, w_in, b_col)
    except Exception:
        # pl.Buffered(1) unsupported on this jax build — fall back to the
        # default double-buffered constant blocks (identical numerics).
        out = build(single_buffer_consts=False)(x, w_in, b_col)

    if t_total != T:
        out = out[:, :, :T]
    return out


def _reference_causal_conv1d(x, weight, bias, kernel_size):
    """Pure-JAX reference mirroring the PyTorch module."""
    left_pad = kernel_size - 1
    x_pad = jnp.pad(x, ((0, 0), (0, 0), (left_pad, 0)))
    out = jax.lax.conv_general_dilated(
        x_pad, weight,
        window_strides=(1,),
        padding="VALID",
        dimension_numbers=("NCH", "OIH", "NCH"),
    )
    return out + bias.reshape(1, -1, 1)


if __name__ == "__main__":
    key = jax.random.PRNGKey(0)
    kx, kw, kb, kx2, kw2, kb2, kx3 = jax.random.split(key, 7)

    # --- primary demo shapes (match the module: B=2, C=4, T=16, K=3) ---
    B, C, T, K = 2, 4, 16, 3
    x = jax.random.normal(kx, (B, C, T), dtype=jnp.float32)
    weight = jax.random.normal(kw, (C, C, K), dtype=jnp.float32) * 0.1
    bias = jax.random.normal(kb, (C,), dtype=jnp.float32) * 0.1

    out = jax.block_until_ready(causal_conv1d(x, weight, bias, K))
    ref = _reference_causal_conv1d(x, weight, bias, K)
    assert out.shape == (B, C, T)
    assert jnp.allclose(out, ref, atol=1e-5, rtol=1e-5), "f32 mismatch vs reference"

    # --- multi-tile: halo carry across time tiles, right-pad path, non-fused taps ---
    B2, C2, T2, K2 = 2, 8, 200, 4
    x2 = jax.random.normal(kx2, (B2, C2, T2), dtype=jnp.float32)
    w2 = jax.random.normal(kw2, (C2, C2, K2), dtype=jnp.float32) * 0.1
    b2 = jax.random.normal(kb2, (C2,), dtype=jnp.float32) * 0.1
    out2 = jax.block_until_ready(
        causal_conv1d(x2, w2, b2, K2, t_blk_max=128, fuse_taps=False))
    ref2 = _reference_causal_conv1d(x2, w2, b2, K2)
    assert out2.shape == (B2, C2, T2)
    assert jnp.allclose(out2, ref2, atol=1e-4, rtol=1e-4), "tiled mismatch vs reference"

    # --- short-sequence edge case (T < K): left padding still exact ---
    x3 = jax.random.normal(kx3, (1, C, 2), dtype=jnp.float32)
    out3 = jax.block_until_ready(causal_conv1d(x3, weight, bias, K))
    ref3 = _reference_causal_conv1d(x3, weight, bias, K)
    assert out3.shape == (1, C, 2)
    assert jnp.allclose(out3, ref3, atol=1e-5, rtol=1e-5), "short-T mismatch vs reference"

    # --- bf16 compute path (activations cast in-kernel, f32 accumulation) ---
    out_bf16 = jax.block_until_ready(
        causal_conv1d(x, weight, bias, K, compute_dtype=jnp.bfloat16))
    assert out_bf16.dtype == jnp.float32
    assert jnp.allclose(out_bf16, ref, atol=5e-2, rtol=5e-2), "bf16 mismatch vs reference"

    print("KERNEL_OK")
</pallas_src>

<mosaic_0001>
module attributes {stable_mosaic.version = 11 : i64} {
  func.func @_causal_conv1d_kernel(%arg0: i32, %arg1: i32, %arg2: memref<1x4x16xf32, #tpu.memory_space<vmem>>, %arg3: memref<4x12xf32, #tpu.memory_space<vmem>>, %arg4: memref<4x1xf32, #tpu.memory_space<vmem>>, %arg5: memref<1x4x16xf32, #tpu.memory_space<vmem>>, %arg6: memref<4x18xf32, #tpu.memory_space<vmem>>) attributes {dimension_semantics = [#tpu.dimension_semantics<parallel>, #tpu.dimension_semantics<arbitrary>], iteration_bounds = array<i64: 2, 1>, scalar_prefetch = 0 : i64, scratch_operands = 1 : i64, tpu.core_type = #tpu.core_type<tc>, window_params = [{transform_indices = @transform_0, window_bounds = array<i64: 1, 4, 16>}, {pipeline_mode = #tpu.pipeline_mode<synchronous>, transform_indices = @transform_1, window_bounds = array<i64: 4, 12>}, {pipeline_mode = #tpu.pipeline_mode<synchronous>, transform_indices = @transform_2, window_bounds = array<i64: 4, 1>}, {transform_indices = @transform_3, window_bounds = array<i64: 1, 4, 16>}]} {
    %c0 = arith.constant 0 : index
    %c0_0 = arith.constant 0 : index
    %c0_1 = arith.constant 0 : index
    %0 = vector.load %arg2[%c0, %c0_0, %c0_1] : memref<1x4x16xf32, #tpu.memory_space<vmem>>, vector<1x4x16xf32>
    %1 = vector.shape_cast %0 : vector<1x4x16xf32> to vector<4x16xf32>
    %c0_i32 = arith.constant 0 : i32
    %2 = arith.cmpi eq, %arg1, %c0_i32 : i32
    %3 = arith.extui %2 : i1 to i32
    %c0_i32_2 = arith.constant 0 : i32
    %4 = arith.cmpi ne, %3, %c0_i32_2 : i32
    scf.if %4 {
      %cst_19 = arith.constant 0.000000e+00 : f32
      %20 = vector.broadcast %cst_19 : f32 to vector<4x2xf32>
      %c0_20 = arith.constant 0 : index
      %c0_21 = arith.constant 0 : index
      %21 = vector.load %arg6[%c0_20, %c0_21] : memref<4x18xf32, #tpu.memory_space<vmem>>, vector<4x2xf32>
      tpu.vector_store %arg6[%c0_20, %c0_21], %20 {strides = array<i32>} : memref<4x18xf32, #tpu.memory_space<vmem>>, vector<4x2xf32>,
    } else {
    }
    %c0_3 = arith.constant 0 : index
    %c2 = arith.constant 2 : index
    %5 = vector.load %arg6[%c0_3, %c2] : memref<4x18xf32, #tpu.memory_space<vmem>>, vector<4x16xf32>
    tpu.vector_store %arg6[%c0_3, %c2], %1 {strides = array<i32>} : memref<4x18xf32, #tpu.memory_space<vmem>>, vector<4x16xf32>,
    %c0_4 = arith.constant 0 : index
    %c0_5 = arith.constant 0 : index
    %6 = vector.load %arg6[%c0_4, %c0_5] : memref<4x18xf32, #tpu.memory_space<vmem>>, vector<4x16xf32>
    %c0_6 = arith.constant 0 : index
    %c1 = arith.constant 1 : index
    %7 = vector.load %arg6[%c0_6, %c1] : memref<4x18xf32, #tpu.memory_space<vmem>>, vector<4x16xf32>
    %c0_7 = arith.constant 0 : index
    %c2_8 = arith.constant 2 : index
    %8 = vector.load %arg6[%c0_7, %c2_8] : memref<4x18xf32, #tpu.memory_space<vmem>>, vector<4x16xf32>
    %9 = tpu.concatenate %6, %7, %8 in 0 : vector<4x16xf32>, vector<4x16xf32>, vector<4x16xf32> -> vector<12x16xf32>
    %c0_9 = arith.constant 0 : index
    %c0_10 = arith.constant 0 : index
    %10 = vector.load %arg3[%c0_9, %c0_10] : memref<4x12xf32, #tpu.memory_space<vmem>>, vector<4x12xf32>
    %cst = arith.constant dense<0.000000e+00> : vector<4x16xf32>
    %11 = tpu.matmul %10, %9, %cst {dimension_numbers = #tpu.dot_dimension_numbers<[1], [0], [0], [1], [0, 0, 1, 1], [], []>} : vector<4x12xf32>, vector<12x16xf32>, vector<4x16xf32> -> vector<4x16xf32>
    %c0_11 = arith.constant 0 : index
    %c0_12 = arith.constant 0 : index
    %12 = vector.load %arg4[%c0_11, %c0_12] : memref<4x1xf32, #tpu.memory_space<vmem>>, vector<4x1xf32>
    %13 = vector.broadcast %12 : vector<4x1xf32> to vector<4x16xf32>
    %14 = arith.addf %11, %13 : vector<4x16xf32>
    %c0_13 = arith.constant 0 : index
    %c0_14 = arith.constant 0 : index
    %c0_15 = arith.constant 0 : index
    %15 = vector.load %arg5[%c0_13, %c0_14, %c0_15] : memref<1x4x16xf32, #tpu.memory_space<vmem>>, vector<1x4x16xf32>
    %16 = vector.shape_cast %15 : vector<1x4x16xf32> to vector<4x16xf32>
    %17 = vector.shape_cast %14 : vector<4x16xf32> to vector<1x4x16xf32>
    tpu.vector_store %arg5[%c0_13, %c0_14, %c0_15], %17 {strides = array<i32>} : memref<1x4x16xf32, #tpu.memory_space<vmem>>, vector<1x4x16xf32>,
    %c0_16 = arith.constant 0 : index
    %c16 = arith.constant 16 : index
    %18 = vector.load %arg6[%c0_16, %c16] : memref<4x18xf32, #tpu.memory_space<vmem>>, vector<4x2xf32>
    %c0_17 = arith.constant 0 : index
    %c0_18 = arith.constant 0 : index
    %19 = vector.load %arg6[%c0_17, %c0_18] : memref<4x18xf32, #tpu.memory_space<vmem>>, vector<4x2xf32>
    tpu.vector_store %arg6[%c0_17, %c0_18], %18 {strides = array<i32>} : memref<4x18xf32, #tpu.memory_space<vmem>>, vector<4x2xf32>,
    return
  }
  func.func @transform_0(%arg0: i32, %arg1: i32) -> (i32, i32, i32) {
    %c0_i32 = arith.constant 0 : i32
    %c0_i32_0 = arith.constant 0 : i32
    return %arg0, %c0_i32, %arg1 : i32, i32, i32
  }
  func.func @transform_1(%arg0: i32, %arg1: i32) -> (i32, i32) {
    %c0_i32 = arith.constant 0 : i32
    %c0_i32_0 = arith.constant 0 : i32
    %c0_i32_1 = arith.constant 0 : i32
    return %c0_i32, %c0_i32_0 : i32, i32
  }
  func.func @transform_2(%arg0: i32, %arg1: i32) -> (i32, i32) {
    %c0_i32 = arith.constant 0 : i32
    %c0_i32_0 = arith.constant 0 : i32
    %c0_i32_1 = arith.constant 0 : i32
    return %c0_i32, %c0_i32_0 : i32, i32
  }
  func.func @transform_3(%arg0: i32, %arg1: i32) -> (i32, i32, i32) {
    %c0_i32 = arith.constant 0 : i32
    %c0_i32_0 = arith.constant 0 : i32
    return %arg0, %c0_i32, %arg1 : i32, i32, i32
  }
}

module attributes {stable_mosaic.version = 11 : i64} {
  func.func @_causal_conv1d_kernel(%arg0: i32, %arg1: i32, %arg2: memref<1x4x16xf32, #tpu.memory_space<vmem>>, %arg3: memref<4x12xf32, #tpu.memory_space<vmem>>, %arg4: memref<4x1xf32, #tpu.memory_space<vmem>>, %arg5: memref<1x4x16xf32, #tpu.memory_space<vmem>>, %arg6: memref<4x18xf32, #tpu.memory_space<vmem>>) attributes {dimension_semantics = [#tpu.dimension_semantics<parallel>, #tpu.dimension_semantics<arbitrary>], iteration_bounds = array<i64: 2, 1>, scalar_prefetch = 0 : i64, scratch_operands = 1 : i64, tpu.core_type = #tpu.core_type<tc>, window_params = [{transform_indices = @transform_0, window_bounds = array<i64: 1, 4, 16>}, {pipeline_mode = #tpu.pipeline_mode<synchronous>, transform_indices = @transform_1, window_bounds = array<i64: 4, 12>}, {pipeline_mode = #tpu.pipeline_mode<synchronous>, transform_indices = @transform_2, window_bounds = array<i64: 4, 1>}, {transform_indices = @transform_3, window_bounds = array<i64: 1, 4, 16>}]} {
    %c0 = arith.constant 0 : index
    %c0_0 = arith.constant 0 : index
    %c0_1 = arith.constant 0 : index
    %0 = vector.load %arg2[%c0, %c0_0, %c0_1] : memref<1x4x16xf32, #tpu.memory_space<vmem>>, vector<1x4x16xf32>
    %1 = vector.shape_cast %0 : vector<1x4x16xf32> to vector<4x16xf32>
    %c0_i32 = arith.constant 0 : i32
    %2 = arith.cmpi eq, %arg1, %c0_i32 : i32
    %3 = arith.extui %2 : i1 to i32
    %c0_i32_2 = arith.constant 0 : i32
    %4 = arith.cmpi ne, %3, %c0_i32_2 : i32
    scf.if %4 {
      %cst_19 = arith.constant 0.000000e+00 : f32
      %20 = vector.broadcast %cst_19 : f32 to vector<4x2xf32>
      %c0_20 = arith.constant 0 : index
      %c0_21 = arith.constant 0 : index
      %21 = vector.load %arg6[%c0_20, %c0_21] : memref<4x18xf32, #tpu.memory_space<vmem>>, vector<4x2xf32>
      tpu.vector_store %arg6[%c0_20, %c0_21], %20 {strides = array<i32>} : memref<4x18xf32, #tpu.memory_space<vmem>>, vector<4x2xf32>,
    } else {
    }
    %c0_3 = arith.constant 0 : index
    %c2 = arith.constant 2 : index
    %5 = vector.load %arg6[%c0_3, %c2] : memref<4x18xf32, #tpu.memory_space<vmem>>, vector<4x16xf32>
    tpu.vector_store %arg6[%c0_3, %c2], %1 {strides = array<i32>} : memref<4x18xf32, #tpu.memory_space<vmem>>, vector<4x16xf32>,
    %c0_4 = arith.constant 0 : index
    %c0_5 = arith.constant 0 : index
    %6 = vector.load %arg6[%c0_4, %c0_5] : memref<4x18xf32, #tpu.memory_space<vmem>>, vector<4x16xf32>
    %c0_6 = arith.constant 0 : index
    %c1 = arith.constant 1 : index
    %7 = vector.load %arg6[%c0_6, %c1] : memref<4x18xf32, #tpu.memory_space<vmem>>, vector<4x16xf32>
    %c0_7 = arith.constant 0 : index
    %c2_8 = arith.constant 2 : index
    %8 = vector.load %arg6[%c0_7, %c2_8] : memref<4x18xf32, #tpu.memory_space<vmem>>, vector<4x16xf32>
    %9 = tpu.concatenate %6, %7, %8 in 0 : vector<4x16xf32>, vector<4x16xf32>, vector<4x16xf32> -> vector<12x16xf32>
    %c0_9 = arith.constant 0 : index
    %c0_10 = arith.constant 0 : index
    %10 = vector.load %arg3[%c0_9, %c0_10] : memref<4x12xf32, #tpu.memory_space<vmem>>, vector<4x12xf32>
    %cst = arith.constant dense<0.000000e+00> : vector<4x16xf32>
    %11 = tpu.matmul %10, %9, %cst {dimension_numbers = #tpu.dot_dimension_numbers<[1], [0], [0], [1], [0, 0, 1, 1], [], []>} : vector<4x12xf32>, vector<12x16xf32>, vector<4x16xf32> -> vector<4x16xf32>
    %c0_11 = arith.constant 0 : index
    %c0_12 = arith.constant 0 : index
    %12 = vector.load %arg4[%c0_11, %c0_12] : memref<4x1xf32, #tpu.memory_space<vmem>>, vector<4x1xf32>
    %13 = vector.broadcast %12 : vector<4x1xf32> to vector<4x16xf32>
    %14 = arith.addf %11, %13 : vector<4x16xf32>
    %c0_13 = arith.constant 0 : index
    %c0_14 = arith.constant 0 : index
    %c0_15 = arith.constant 0 : index
    %15 = vector.load %arg5[%c0_13, %c0_14, %c0_15] : memref<1x4x16xf32, #tpu.memory_space<vmem>>, vector<1x4x16xf32>
    %16 = vector.shape_cast %15 : vector<1x4x16xf32> to vector<4x16xf32>
    %17 = vector.shape_cast %14 : vector<4x16xf32> to vector<1x4x16xf32>
    tpu.vector_store %arg5[%c0_13, %c0_14, %c0_15], %17 {strides = array<i32>} : memref<1x4x16xf32, #tpu.memory_space<vmem>>, vector<1x4x16xf32>,
    %c0_16 = arith.constant 0 : index
    %c16 = arith.constant 16 : index
    %18 = vector.load %arg6[%c0_16, %c16] : memref<4x18xf32, #tpu.memory_space<vmem>>, vector<4x2xf32>
    %c0_17 = arith.constant 0 : index
    %c0_18 = arith.constant 0 : index
    %19 = vector.load %arg6[%c0_17, %c0_18] : memref<4x18xf32, #tpu.memory_space<vmem>>, vector<4x2xf32>
    tpu.vector_store %arg6[%c0_17, %c0_18], %18 {strides = array<i32>} : memref<4x18xf32, #tpu.memory_space<vmem>>, vector<4x2xf32>,
    return
  }
  func.func @transform_0(%arg0: i32, %arg1: i32) -> (i32, i32, i32) {
    %c0_i32 = arith.constant 0 : i32
    %c0_i32_0 = arith.constant 0 : i32
    return %arg0, %c0_i32, %arg1 : i32, i32, i32
  }
  func.func @transform_1(%arg0: i32, %arg1: i32) -> (i32, i32) {
    %c0_i32 = arith.constant 0 : i32
    %c0_i32_0 = arith.constant 0 : i32
    %c0_i32_1 = arith.constant 0 : i32
    return %c0_i32, %c0_i32_0 : i32, i32
  }
  func.func @transform_2(%arg0: i32, %arg1: i32) -> (i32, i32) {
    %c0_i32 = arith.constant 0 : i32
    %c0_i32_0 = arith.constant 0 : i32
    %c0_i32_1 = arith.constant 0 : i32
    return %c0_i32, %c0_i32_0 : i32, i32
  }
  func.func @transform_3(%arg0: i32, %arg1: i32) -> (i32, i32, i32) {
    %c0_i32 = arith.constant 0 : i32
    %c0_i32_0 = arith.constant 0 : i32
    return %arg0, %c0_i32, %arg1 : i32, i32, i32
  }
}

</mosaic_0001>

<bundles_post_ra>
// kernel: tpu_custom_call.1
= control target key start
LH: loop header
LB: loop body
LE: loop exit
PB: predicated region body
PF: predicated region fallthrough
CT: control target
= control target key end

     0   :  { %8 = vsyncpa [#allocation4], 0  ;;  %s844_s0 = inlined_call_operand.hbm [shape: f32[2,4,16], index: 0, kind: input, shape index: {}]   ;;  %s845_s1 = inlined_call_operand.vmem [shape: f32[4,12], index: 1, kind: input, shape index: {}]   ;;  %s846_s2 = inlined_call_operand.vmem [shape: f32[4,1], index: 2, kind: input, shape index: {}]   ;;  %s847_s3 = inlined_call_operand.hbm [shape: f32[2,4,16], index: 3, kind: output, shape index: {}]  }
   0x1   :  { %10 = vsyncpa [#allocation4 + $0x1], 0 }
   0x2   :  { %11 = vsyncpa [#allocation5], 0 }
   0x3   :  { %13 = vsyncpa [#allocation5 + $0x1], 0  ;;  %s660_s12 = smov 0   ;;  %s662_s13 = smov 0  }
   0x4   :  { %s664_s14 = smov 0   ;;  %s666_s15 = smov 0  }
   0x5   :  { %s668_s16 = smov 0   ;;  %s670_s17 = smov 0  }
   0x6 LB: > { %s413_s18 = sadd.s32 4294967295, %s627_s17   ;;  %s414_s19 = sadd.s32 4294967294, %s627_s17   ;;  %s627_s17 = sphi %s670_s17, %s19_s17   ;;  %s623_s16 = sphi %s668_s16, %s863_s16   ;;  %s619_s15 = sphi %s666_s15, %s862_s15   ;;  %s615_s14 = sphi %s664_s14, %s861_s14   ;;  %s611_s13 = sphi %s662_s13, %s860_s13   ;;  %s607_s12 = sphi %s660_s12, %s859_s12  }
   0x7   : > { %s31_s20 = sadd.s32 1, %s623_s16  ;;  %s40_s21 = sadd.s32 1, %s615_s14 }
   0x8   : > { %p33_p0 = scmp.ge.s32.totalorder %s31_s20, 2  ;;  %p47_p1 = scmp.ne.s32.totalorder %s615_s14, %s611_s13 }
   0x9   : > { %p48_p2 = scmp.eq.s32.totalorder %s627_s17, 0  ;;  %p53_p3 = scmp.ne.s32.totalorder %s611_s13, %s607_s12 }
   0xa   : > { %s865_s20 = smov (%p33_p0, %s31_s20), 0  ;;  %p54_p5 = scmp.eq.s32.totalorder %s413_s18, 0 }
   0xb   : > { %p701_p4 = por %p48_p2, %p47_p1  ;;  %s35_s23 = ssub.s32 %s623_s16, %s865_s20 }
   0xc   : > { %p121_p6 = scmp.eq.s32.totalorder %s413_s18, 1  ;;  %p38_p7 = scmp.eq.s32.totalorder %s35_s23, 0 }
   0xd   : > { %p707_p8 = por %p54_p5, %p53_p3  ;;  %p127_p10 = scmp.eq.s32.totalorder %s414_s19, 1 }
   0xe   : > { %p711_p9 = por %p121_p6, %p47_p1  ;;  %p454_p13 = scmp.lt.s32.totalorder %s627_s17, 2 }
   0xf   : > { %s716_s26 = scalar_select %p38_p7, %s615_s14, %s40_s21  }
  0x10   : > { %s851_s25 = scalar_select %p711_p9, 1, 0 }
  0x11   : > { %p718_p11 = por %p127_p10, %p53_p3  ;;  %s153_s28 = sand.u32 1, %s615_s14  }
  0x12   : > { %s417_s29 = sshll.u32 %s153_s28, 2  ;;  %s418_s30 = sshll.u32 %s623_s16, 6 }
  0x13   : > { %s852_s27 = scalar_select %p718_p11, 1, 0 }
  0x14   : > { %s729_s6 = scalar_lea.hbm %s844_s0, %s418_s30  ;;  %s157_s7 = scalar_lea.vmem [#allocation3], %s417_s29 }
  0x15   : > { %s165_s8 = sshll.u32 %s157_s7, 4  ;;  %p735_p0 = pnand %p454_p13, %p701_p4  ;;  %s731_s8 = int_to_ptr.vmem [resolvable:$true] %s165_s8 }
  0x16   : > { %s154_s10 = scalar_lea.sflag [#allocation4], %s153_s28  ;;  %s515_s11 = scalar_lea.hbm %s729_s6, 64 }
  0x17   : > { %p516_p3 = scmp.ne.s32.totalorder %s729_s6, %s515_s11  ;;  %p517_p5 = pneg %p735_p0 }
  0x18   : > { %s520_s21 = scalar_lea.hbm %s844_s0, 128  ;;  %p521_p4 = scmp.lt.u32.totalorder %s729_s6, %s844_s0 }
  0x19   : > { %p518_p6 = pnand %p517_p5, %p516_p3  ;;  %p522_p10 = scmp.lt.u32.totalorder %s520_s21, %s515_s11 }
  0x1a   : > { %p524_p12 = scmp.lt.u32.totalorder %s515_s11, %s729_s6 }
  0x1b   : > { %p519_p7 = pneg %p518_p6  ;;  %p523_p13 = por %p522_p10, %p521_p4 }
  0x1d   : > { %p525_p1 = por %p524_p12, %p523_p13 }
  0x1f   : > { %p526_p2 = pnand %p525_p1, %p519_p7 }
  0x21   : > { %529 = shalt.err (!%p526_p2)
}
  0x22   : > { %s530_s28 = scalar_lea.vmem %s731_s8, 64  ;;  %s629_s29 = smov [#allocation3]  }
  0x23   : > { %p531_p3 = scmp.ne.s32.totalorder %s731_s8, %s530_s28  ;;  %s535_s30 = sshll.u32 %s629_s29, 4  ;;  %s536_s30 = int_to_ptr.vmem [resolvable:$false] %s535_s30 }
  0x24   : > { %s537_s4 = scalar_lea.vmem %s536_s30, 128  ;;  %p538_p9 = scmp.lt.s32.totalorder %s731_s8, %s536_s30 }
  0x25   : > { %p533_p6 = pnand %p531_p3, %p517_p5  ;;  %p539_p4 = scmp.lt.s32.totalorder %s537_s4, %s530_s28 }
  0x27   : > { %p534_p11 = pneg %p533_p6  ;;  %p540_p10 = por %p539_p4, %p538_p9 }
  0x29   : > { %p541_p12 = pnand %p540_p10, %p534_p11 }
  0x2b   : > { %544 = shalt.err (!%p541_p12)
}
  0x2c   : > { %449 = dma.hbm_to_vmem [thread:$0]  (!%p735_p0), %s729_s6, 64, %s731_s8, %s154_s10  }
  0x2d   : > { %p854_p1 = scmp.lt.s32.totalorder %s627_s17, 3  ;;  %p855_p2 = scmp.ge.s32.totalorder %s627_s17, 1 }
  0x2f   : > { %p171_p5 = pnand %p855_p2, %p854_p1 }
  0x30   : > { %s771_s5 = sand.u32 (!%p171_p5), 1, %s611_s13  }
  0x31   : > { %174 = sbr.rel (%p171_p5) target bundleno = 532 (0x214), region = 32  ;;  %s420_s7 = sshll.u32 (!%p171_p5), %s771_s5, 2 }
  0x32   : > { %s177_s11 = scalar_lea.sflag (!%p171_p5), [#allocation4], %s771_s5  ;;  %s180_s9 = scalar_lea.vmem (!%p171_p5), [#allocation3], %s420_s7 }
  0x38   : > { %598 = dma.done.wait (%p707_p8), %s177_s11, 64  }
  0x39   : > { %600 = vsyncadd (%p707_p8), %s177_s11, 4294967232  ;;  %vm208_vm0 = vcmask 11264   ;;  %v630_v0 = vmov 0.0   ;;  %v203_v1 = vld [vmem:[%s180_s9] sm:$0xf]  ;;  %s631_s6 = smov 2  }
  0x3a   : > { %209 = vst.msk [vmem:[#allocation2] sm:$0xf] %vm208_vm0, %v630_v0  ;;  %211 = vrot.lane.b32.xlu0 %v203_v1, %s631_s6  ;;  %vm214_vm1 = vcmask 142352   ;;  %v632_v3 = vmov 0.0|0.0   ;;  %vm633_vm2 = vmmov 0   ;;  %v634_v4 = vmov 0  }
  0x3b   : > { %438 = vmatprep.subr.bf16.mxu0 %v632_v3  ;;  %435 = vmatprep.mubr.msk.f32.mxu0 %vm633_vm2, %v630_v0  ;;  %s635_s24 = smov 126   ;;  %v227_v7 = vld [vmem:[%s846_s2] sm:$0xf]  ;;  %s636_s18 = smov 127   ;;  %vm224_vm3 = vcmask 1043456   ;;  %vm638_vm4 = vmmov 1  }
  0x3c   : > { %513 = vset.pattern.permute.xlu1 %v634_v4  ;;  %514 = vset.pattern.permute.xlu0 %v634_v4  ;;  %s637_s19 = smov 112   ;;  %vm440_vm5 = vmpackc.low %vm224_vm3, %vm638_vm4  ;;  %v226_v14 = vld [vmem:[%s845_s1] sm:$0xf]  ;;  %vm233_vm6 = vcmask 97280   ;;  %s425_s23 = sshll.u32 %s619_s15, 6  ;;  %vm309_vm7 = vcmask 125952  }
  0x3d   : > { %s202_s28 = scalar_lea.vmem [#allocation6], %s420_s7  ;;  %s795_s11 = scalar_lea.hbm %s847_s3, %s425_s23 }
  0x3e   : > { %s333_s29 = sshll.u32 %s202_s28, 4  ;;  %s319_s9 = scalar_lea.sflag [#allocation5], %s771_s5  ;;  %s797_s29 = int_to_ptr.vmem [resolvable:$true] %s333_s29 }
  0x3f   : > { %s545_s15 = scalar_lea.vmem %s797_s29, 64  ;;  %p856_p9 = scmp.ne.s32.totalorder %s851_s25, 0 }
  0x40   : > { %p546_p8 = scmp.ne.s32.totalorder %s797_s29, %s545_s15  ;;  %s639_s7 = smov [#allocation6]  }
  0x41   : > { %s549_s6 = sshll.u32 %s639_s7, 4  ;;  %s550_s6 = int_to_ptr.vmem [resolvable:$false] %s549_s6 }
  0x42   : > { %p547_p11 = pnand %p546_p8, %p856_p9  ;;  %p552_p7 = scmp.lt.s32.totalorder %s797_s29, %s550_s6 }
  0x44   : > { %p548_p0 = pneg %p547_p11 }
  0xac   : > { %v212_v2 = vpop.permute.xlu0 %211 }
  0xad   : > { %215 = vst.msk [vmem:[#allocation2] sm:$0xf] %vm214_vm1, %v212_v2 }
  0xb4   : > { %v216_v5 = vld [vmem:[#allocation2] sm:$0xf] }
  0xb5   : > { %222 = vrot.lane.b32.xlu1 %v216_v5, %s635_s24  ;;  %v218_v6 = vrot.slane %v216_v5, 4  ;;  %v311_v8 = vld [vmem:[#allocation2] sm:$0xf]  ;;  %s551_s24 = scalar_lea.vmem %s550_s6, 128 }
  0xb6   : > { %p553_p13 = scmp.lt.s32.totalorder %s551_s24, %s545_s15 }
  0xb7   : > { %219 = vrot.lane.b32.xlu0 %v218_v6, %s636_s18 }
  0xb8   : > { %p554_p3 = por %p553_p13, %p552_p7 }
  0xb9   : > { %230 = vperm.xlu1 %513, %v227_v7  }
  0xba   : > { %p555_p6 = pnand %p554_p3, %p548_p0 }
  0xbb   : > { %313 = vrot.lane.b32.xlu0 %v311_v8, %s637_s19 }
 0x127   : > { %v223_v10 = vpop.permute.xlu1 %222 }
 0x129   : > { %v220_v9 = vpop.permute.xlu0 %219 }
 0x12a   : > { %v225_v11 = vsel %vm224_vm3, %v216_v5, %v220_v9 }
 0x12b   : > { %v439_v12 = vpack.c.bf16 %v223_v10, %v225_v11 }
 0x12d   : > { %441 = vmatpush3.bf16.msk.msra.mxu0 %vm440_vm5, %v439_v12  ;;  %v314_v13 = vpop.permute.xlu0 %313 }
 0x12e   : > { %317 = vst.msk [vmem:[#allocation2] sm:$0xf] %vm208_vm0, %v314_v13 }
 0x130   : > { %436 = vmatmul.mubr.msk.f32.vlgmr.msra.gmra.mrb[0].mxu0 %vm233_vm6, %v226_v14 }
 0x138   : > { %v231_v15 = vpop.permute.xlu1 %230 }
 0x203   : > { %v305_v16 = vpop.f32.mrb[0].mxu0 }
 0x204   : > { %v306_v17 = vadd.f32 %v305_v16, %v231_v15  ;;  %v437_v18 = vpop.f32.mrb[1].mxu0 }
 0x206   : > { %310 = vst.msk [vmem:[%s202_s28] sm:$0xf] %vm309_vm7, %v306_v17 }
 0x207   : > { %558 = shalt.err (!%p555_p6)
}
 0x208   : > { %s559_s5 = scalar_lea.hbm %s795_s11, 64  ;;  %s563_s18 = scalar_lea.hbm %s847_s3, 128 }
 0x209   : > { %p560_p4 = scmp.ne.s32.totalorder %s795_s11, %s559_s5  ;;  %p564_p1 = scmp.lt.u32.totalorder %s795_s11, %s847_s3 }
 0x20a   : > { %p565_p2 = scmp.lt.u32.totalorder %s563_s18, %s559_s5  ;;  %p567_p8 = scmp.lt.u32.totalorder %s559_s5, %s795_s11 }
 0x20b   : > { %p561_p10 = pnand %p560_p4, %p856_p9 }
 0x20c   : > { %p566_p5 = por %p565_p2, %p564_p1 }
 0x20d   : > { %p562_p12 = pneg %p561_p10 }
 0x20e   : > { %p568_p11 = por %p567_p8, %p566_p5 }
 0x210   : > { %p569_p0 = pnand %p568_p11, %p562_p12 }
 0x212   : > { %572 = shalt.err (!%p569_p0)
}
 0x213   : > { %444 = dma.vmem_to_hbm [thread:$0]  (%p856_p9), %s797_s29, 64, %s795_s11, %s319_s9  }
 0x214 PF: > { %s345_s22 = sand.u32 1, %s607_s12   ;;  %p857_p7 = scmp.ne.s32.totalorder %s852_s27, 0 }
 0x215   : > { %p858_p13 = scmp.ge.s32.totalorder %s627_s17, 2  ;;  %s346_s23 = scalar_lea.sflag [#allocation5], %s345_s22 }
 0x217   : > { %p451_p3 = pnand %p858_p13, %p857_p7 }
 0x219   : > { %602 = dma.done.wait (!%p451_p3), %s346_s23, 64  }
 0x21a   : > { %604 = vsyncadd (!%p451_p3), %s346_s23, 4294967232  ;;  %s19_s17 = sadd.s32 1, %s627_s17   ;;  %s859_s12 = smov %s611_s13 }
 0x21b   : > { %p16_p6 = scmp.ge.s32.totalorder %s19_s17, 4   ;;  %s860_s13 = smov %s615_s14 }
 0x21c   : > { %s861_s14 = smov %s716_s26  ;;  %s862_s15 = smov %s623_s16 }
 0x21d   : > { %s863_s16 = smov %s865_s20  ;;  %18 = sbr.rel (!%p16_p6) target bundleno = 6 (0x6), region = 81 }
 0x224   :  { %351 = vsyncpa [#allocation4], 1 }
 0x225   :  { %353 = vsyncpa [#allocation4 + $0x1], 1 }
 0x226   :  { %354 = vsyncpa [#allocation5], 1 }
 0x227   :  { %356 = vsyncpa [#allocation5 + $0x1], 1 }

// kernel: tpu_custom_call.1
= control target key start
LH: loop header
LB: loop body
LE: loop exit
PB: predicated region body
PF: predicated region fallthrough
CT: control target
= control target key end

     0   :  { %8 = vsyncpa [#allocation4], 0  ;;  %s844_s0 = inlined_call_operand.hbm [shape: f32[2,4,16], index: 0, kind: input, shape index: {}]   ;;  %s845_s1 = inlined_call_operand.vmem [shape: f32[4,12], index: 1, kind: input, shape index: {}]   ;;  %s846_s2 = inlined_call_operand.vmem [shape: f32[4,1], index: 2, kind: input, shape index: {}]   ;;  %s847_s3 = inlined_call_operand.hbm [shape: f32[2,4,16], index: 3, kind: output, shape index: {}]  }
   0x1   :  { %10 = vsyncpa [#allocation4 + $0x1], 0 }
   0x2   :  { %11 = vsyncpa [#allocation5], 0 }
   0x3   :  { %13 = vsyncpa [#allocation5 + $0x1], 0  ;;  %s660_s12 = smov 0   ;;  %s662_s13 = smov 0  }
   0x4   :  { %s664_s14 = smov 0   ;;  %s666_s15 = smov 0  }
   0x5   :  { %s668_s16 = smov 0   ;;  %s670_s17 = smov 0  }
   0x6 LB: > { %s413_s18 = sadd.s32 4294967295, %s627_s17   ;;  %s414_s19 = sadd.s32 4294967294, %s627_s17   ;;  %s627_s17 = sphi %s670_s17, %s19_s17   ;;  %s623_s16 = sphi %s668_s16, %s863_s16   ;;  %s619_s15 = sphi %s666_s15, %s862_s15   ;;  %s615_s14 = sphi %s664_s14, %s861_s14   ;;  %s611_s13 = sphi %s662_s13, %s860_s13   ;;  %s607_s12 = sphi %s660_s12, %s859_s12  }
   0x7   : > { %s31_s20 = sadd.s32 1, %s623_s16  ;;  %s40_s21 = sadd.s32 1, %s615_s14 }
   0x8   : > { %p33_p0 = scmp.ge.s32.totalorder %s31_s20, 2  ;;  %p47_p1 = scmp.ne.s32.totalorder %s615_s14, %s611_s13 }
   0x9   : > { %p48_p2 = scmp.eq.s32.totalorder %s627_s17, 0  ;;  %p53_p3 = scmp.ne.s32.totalorder %s611_s13, %s607_s12 }
   0xa   : > { %s865_s20 = smov (%p33_p0, %s31_s20), 0  ;;  %p54_p5 = scmp.eq.s32.totalorder %s413_s18, 0 }
   0xb   : > { %p701_p4 = por %p48_p2, %p47_p1  ;;  %s35_s23 = ssub.s32 %s623_s16, %s865_s20 }
   0xc   : > { %p121_p6 = scmp.eq.s32.totalorder %s413_s18, 1  ;;  %p38_p7 = scmp.eq.s32.totalorder %s35_s23, 0 }
   0xd   : > { %p707_p8 = por %p54_p5, %p53_p3  ;;  %p127_p10 = scmp.eq.s32.totalorder %s414_s19, 1 }
   0xe   : > { %p711_p9 = por %p121_p6, %p47_p1  ;;  %p454_p13 = scmp.lt.s32.totalorder %s627_s17, 2 }
   0xf   : > { %s716_s26 = scalar_select %p38_p7, %s615_s14, %s40_s21  }
  0x10   : > { %s851_s25 = scalar_select %p711_p9, 1, 0 }
  0x11   : > { %p718_p11 = por %p127_p10, %p53_p3  ;;  %s153_s28 = sand.u32 1, %s615_s14  }
  0x12   : > { %s417_s29 = sshll.u32 %s153_s28, 2  ;;  %s418_s30 = sshll.u32 %s623_s16, 6 }
  0x13   : > { %s852_s27 = scalar_select %p718_p11, 1, 0 }
  0x14   : > { %s729_s6 = scalar_lea.hbm %s844_s0, %s418_s30  ;;  %s157_s7 = scalar_lea.vmem [#allocation3], %s417_s29 }
  0x15   : > { %s165_s8 = sshll.u32 %s157_s7, 4  ;;  %p735_p0 = pnand %p454_p13, %p701_p4  ;;  %s731_s8 = int_to_ptr.vmem [resolvable:$true] %s165_s8 }
  0x16   : > { %s154_s10 = scalar_lea.sflag [#allocation4], %s153_s28  ;;  %s515_s11 = scalar_lea.hbm %s729_s6, 64 }
  0x17   : > { %p516_p3 = scmp.ne.s32.totalorder %s729_s6, %s515_s11  ;;  %p517_p5 = pneg %p735_p0 }
  0x18   : > { %s520_s21 = scalar_lea.hbm %s844_s0, 128  ;;  %p521_p4 = scmp.lt.u32.totalorder %s729_s6, %s844_s0 }
  0x19   : > { %p518_p6 = pnand %p517_p5, %p516_p3  ;;  %p522_p10 = scmp.lt.u32.totalorder %s520_s21, %s515_s11 }
  0x1a   : > { %p524_p12 = scmp.lt.u32.totalorder %s515_s11, %s729_s6 }
  0x1b   : > { %p519_p7 = pneg %p518_p6  ;;  %p523_p13 = por %p522_p10, %p521_p4 }
  0x1d   : > { %p525_p1 = por %p524_p12, %p523_p13 }
  0x1f   : > { %p526_p2 = pnand %p525_p1, %p519_p7 }
  0x21   : > { %529 = shalt.err (!%p526_p2)
}
  0x22   : > { %s530_s28 = scalar_lea.vmem %s731_s8, 64  ;;  %s629_s29 = smov [#allocation3]  }
  0x23   : > { %p531_p3 = scmp.ne.s32.totalorder %s731_s8, %s530_s28  ;;  %s535_s30 = sshll.u32 %s629_s29, 4  ;;  %s536_s30 = int_to_ptr.vmem [resolvable:$false] %s535_s30 }
  0x24   : > { %s537_s4 = scalar_lea.vmem %s536_s30, 128  ;;  %p538_p9 = scmp.lt.s32.totalorder %s731_s8, %s536_s30 }
  0x25   : > { %p533_p6 = pnand %p531_p3, %p517_p5  ;;  %p539_p4 = scmp.lt.s32.totalorder %s537_s4, %s530_s28 }
  0x27   : > { %p534_p11 = pneg %p533_p6  ;;  %p540_p10 = por %p539_p4, %p538_p9 }
  0x29   : > { %p541_p12 = pnand %p540_p10, %p534_p11 }
  0x2b   : > { %544 = shalt.err (!%p541_p12)
}
  0x2c   : > { %449 = dma.hbm_to_vmem [thread:$0]  (!%p735_p0), %s729_s6, 64, %s731_s8, %s154_s10  }
  0x2d   : > { %p854_p1 = scmp.lt.s32.totalorder %s627_s17, 3  ;;  %p855_p2 = scmp.ge.s32.totalorder %s627_s17, 1 }
  0x2f   : > { %p171_p5 = pnand %p855_p2, %p854_p1 }
  0x30   : > { %s771_s5 = sand.u32 (!%p171_p5), 1, %s611_s13  }
  0x31   : > { %174 = sbr.rel (%p171_p5) target bundleno = 532 (0x214), region = 32  ;;  %s420_s7 = sshll.u32 (!%p171_p5), %s771_s5, 2 }
  0x32   : > { %s177_s11 = scalar_lea.sflag (!%p171_p5), [#allocation4], %s771_s5  ;;  %s180_s9 = scalar_lea.vmem (!%p171_p5), [#allocation3], %s420_s7 }
  0x38   : > { %598 = dma.done.wait (%p707_p8), %s177_s11, 64  }
  0x39   : > { %600 = vsyncadd (%p707_p8), %s177_s11, 4294967232  ;;  %vm208_vm0 = vcmask 11264   ;;  %v630_v0 = vmov 0.0   ;;  %v203_v1 = vld [vmem:[%s180_s9] sm:$0xf]  ;;  %s631_s6 = smov 2  }
  0x3a   : > { %209 = vst.msk [vmem:[#allocation2] sm:$0xf] %vm208_vm0, %v630_v0  ;;  %211 = vrot.lane.b32.xlu0 %v203_v1, %s631_s6  ;;  %vm214_vm1 = vcmask 142352   ;;  %v632_v3 = vmov 0.0|0.0   ;;  %vm633_vm2 = vmmov 0   ;;  %v634_v4 = vmov 0  }
  0x3b   : > { %438 = vmatprep.subr.bf16.mxu0 %v632_v3  ;;  %435 = vmatprep.mubr.msk.f32.mxu0 %vm633_vm2, %v630_v0  ;;  %s635_s24 = smov 126   ;;  %v227_v7 = vld [vmem:[%s846_s2] sm:$0xf]  ;;  %s636_s18 = smov 127   ;;  %vm224_vm3 = vcmask 1043456   ;;  %vm638_vm4 = vmmov 1  }
  0x3c   : > { %513 = vset.pattern.permute.xlu1 %v634_v4  ;;  %514 = vset.pattern.permute.xlu0 %v634_v4  ;;  %s637_s19 = smov 112   ;;  %vm440_vm5 = vmpackc.low %vm224_vm3, %vm638_vm4  ;;  %v226_v14 = vld [vmem:[%s845_s1] sm:$0xf]  ;;  %vm233_vm6 = vcmask 97280   ;;  %s425_s23 = sshll.u32 %s619_s15, 6  ;;  %vm309_vm7 = vcmask 125952  }
  0x3d   : > { %s202_s28 = scalar_lea.vmem [#allocation6], %s420_s7  ;;  %s795_s11 = scalar_lea.hbm %s847_s3, %s425_s23 }
  0x3e   : > { %s333_s29 = sshll.u32 %s202_s28, 4  ;;  %s319_s9 = scalar_lea.sflag [#allocation5], %s771_s5  ;;  %s797_s29 = int_to_ptr.vmem [resolvable:$true] %s333_s29 }
  0x3f   : > { %s545_s15 = scalar_lea.vmem %s797_s29, 64  ;;  %p856_p9 = scmp.ne.s32.totalorder %s851_s25, 0 }
  0x40   : > { %p546_p8 = scmp.ne.s32.totalorder %s797_s29, %s545_s15  ;;  %s639_s7 = smov [#allocation6]  }
  0x41   : > { %s549_s6 = sshll.u32 %s639_s7, 4  ;;  %s550_s6 = int_to_ptr.vmem [resolvable:$false] %s549_s6 }
  0x42   : > { %p547_p11 = pnand %p546_p8, %p856_p9  ;;  %p552_p7 = scmp.lt.s32.totalorder %s797_s29, %s550_s6 }
  0x44   : > { %p548_p0 = pneg %p547_p11 }
  0xac   : > { %v212_v2 = vpop.permute.xlu0 %211 }
  0xad   : > { %215 = vst.msk [vmem:[#allocation2] sm:$0xf] %vm214_vm1, %v212_v2 }
  0xb4   : > { %v216_v5 = vld [vmem:[#allocation2] sm:$0xf] }
  0xb5   : > { %222 = vrot.lane.b32.xlu1 %v216_v5, %s635_s24  ;;  %v218_v6 = vrot.slane %v216_v5, 4  ;;  %v311_v8 = vld [vmem:[#allocation2] sm:$0xf]  ;;  %s551_s24 = scalar_lea.vmem %s550_s6, 128 }
  0xb6   : > { %p553_p13 = scmp.lt.s32.totalorder %s551_s24, %s545_s15 }
  0xb7   : > { %219 = vrot.lane.b32.xlu0 %v218_v6, %s636_s18 }
  0xb8   : > { %p554_p3 = por %p553_p13, %p552_p7 }
  0xb9   : > { %230 = vperm.xlu1 %513, %v227_v7  }
  0xba   : > { %p555_p6 = pnand %p554_p3, %p548_p0 }
  0xbb   : > { %313 = vrot.lane.b32.xlu0 %v311_v8, %s637_s19 }
 0x127   : > { %v223_v10 = vpop.permute.xlu1 %222 }
 0x129   : > { %v220_v9 = vpop.permute.xlu0 %219 }
 0x12a   : > { %v225_v11 = vsel %vm224_vm3, %v216_v5, %v220_v9 }
 0x12b   : > { %v439_v12 = vpack.c.bf16 %v223_v10, %v225_v11 }
 0x12d   : > { %441 = vmatpush3.bf16.msk.msra.mxu0 %vm440_vm5, %v439_v12  ;;  %v314_v13 = vpop.permute.xlu0 %313 }
 0x12e   : > { %317 = vst.msk [vmem:[#allocation2] sm:$0xf] %vm208_vm0, %v314_v13 }
 0x130   : > { %436 = vmatmul.mubr.msk.f32.vlgmr.msra.gmra.mrb[0].mxu0 %vm233_vm6, %v226_v14 }
 0x138   : > { %v231_v15 = vpop.permute.xlu1 %230 }
 0x203   : > { %v305_v16 = vpop.f32.mrb[0].mxu0 }
 0x204   : > { %v306_v17 = vadd.f32 %v305_v16, %v231_v15  ;;  %v437_v18 = vpop.f32.mrb[1].mxu0 }
 0x206   : > { %310 = vst.msk [vmem:[%s202_s28] sm:$0xf] %vm309_vm7, %v306_v17 }
 0x207   : > { %558 = shalt.err (!%p555_p6)
}
 0x208   : > { %s559_s5 = scalar_lea.hbm %s795_s11, 64  ;;  %s563_s18 = scalar_lea.hbm %s847_s3, 128 }
 0x209   : > { %p560_p4 = scmp.ne.s32.totalorder %s795_s11, %s559_s5  ;;  %p564_p1 = scmp.lt.u32.totalorder %s795_s11, %s847_s3 }
 0x20a   : > { %p565_p2 = scmp.lt.u32.totalorder %s563_s18, %s559_s5  ;;  %p567_p8 = scmp.lt.u32.totalorder %s559_s5, %s795_s11 }
 0x20b   : > { %p561_p10 = pnand %p560_p4, %p856_p9 }
 0x20c   : > { %p566_p5 = por %p565_p2, %p564_p1 }
 0x20d   : > { %p562_p12 = pneg %p561_p10 }
 0x20e   : > { %p568_p11 = por %p567_p8, %p566_p5 }
 0x210   : > { %p569_p0 = pnand %p568_p11, %p562_p12 }
 0x212   : > { %572 = shalt.err (!%p569_p0)
}
 0x213   : > { %444 = dma.vmem_to_hbm [thread:$0]  (%p856_p9), %s797_s29, 64, %s795_s11, %s319_s9  }
 0x214 PF: > { %s345_s22 = sand.u32 1, %s607_s12   ;;  %p857_p7 = scmp.ne.s32.totalorder %s852_s27, 0 }
 0x215   : > { %p858_p13 = scmp.ge.s32.totalorder %s627_s17, 2  ;;  %s346_s23 = scalar_lea.sflag [#allocation5], %s345_s22 }
 0x217   : > { %p451_p3 = pnand %p858_p13, %p857_p7 }
 0x219   : > { %602 = dma.done.wait (!%p451_p3), %s346_s23, 64  }
 0x21a   : > { %604 = vsyncadd (!%p451_p3), %s346_s23, 4294967232  ;;  %s19_s17 = sadd.s32 1, %s627_s17   ;;  %s859_s12 = smov %s611_s13 }
 0x21b   : > { %p16_p6 = scmp.ge.s32.totalorder %s19_s17, 4   ;;  %s860_s13 = smov %s615_s14 }
 0x21c   : > { %s861_s14 = smov %s716_s26  ;;  %s862_s15 = smov %s623_s16 }
 0x21d   : > { %s863_s16 = smov %s865_s20  ;;  %18 = sbr.rel (!%p16_p6) target bundleno = 6 (0x6), region = 81 }
 0x224   :  { %351 = vsyncpa [#allocation4], 1 }
 0x225   :  { %353 = vsyncpa [#allocation4 + $0x1], 1 }
 0x226   :  { %354 = vsyncpa [#allocation5], 1 }
 0x227   :  { %356 = vsyncpa [#allocation5 + $0x1], 1 }

</bundles_post_ra>
